<compile_context>
chip_gen: v5e
topology: v5e:2x2
jax: 0.10.0
libtpu: 0.0.40
codegen_flags: <defaults>
</compile_context>

<pallas_src>
import functools
import math

import jax
import jax.numpy as jnp
from jax.experimental import pallas as pl
from jax.experimental.pallas import tpu as pltpu


def _kde_kernel(x_ref, o_ref, *, n, dim_real, h_coef, thresh, eps):
    # x_ref block: (TB, N, Dp); o_ref block: (TB, 1, Dp).  Dp is the
    # lane-padded feature count, dim_real the true feature count used for all
    # normalizations (padded lanes are zero and contribute nothing).
    x = x_ref[...].astype(jnp.float32)                        # (TB, N, Dp)

    mu = jnp.mean(x, axis=1, keepdims=True)                   # (TB, 1, Dp)
    xc = x - mu                                               # centered; x is dead after this
    xc2 = xc * xc                                             # (TB, N, Dp)

    # sigma: std over the N samples (unbiased=False), averaged over the REAL
    # features (padded features have zero std so a plain sum / dim_real works).
    var = jnp.mean(xc2, axis=1, keepdims=True)                # (TB, 1, Dp)
    sigma = jnp.sum(jnp.sqrt(var), axis=2, keepdims=True) / float(dim_real) + eps
    h = h_coef * sigma + eps                                  # Silverman bandwidth (TB, 1, 1)

    # Squared norms in f32 (exact diagonal), no eye-mask / N^2 passes:
    #   sq_row: direct lane reduction of the already-materialized xc2,
    #   sq_col: ones-matvec -> lands directly on the lane axis (avoids a
    #           narrow (N,1)->(1,N) sublane->lane relayout).
    sq_row = jnp.sum(xc2, axis=2, keepdims=True)              # (TB, N, 1)
    ones_row = jnp.ones((xc2.shape[0], 1, xc2.shape[2]), jnp.float32)
    sq_col = jnp.einsum("bud,bnd->bun", ones_row, xc2,
                        preferred_element_type=jnp.float32)   # (TB, 1, N)

    # Centered Gram on the MXU: bf16 operands, f32 accumulation (bf16-native
    # MXU on v5e/v6e/v7x; emulated f32 matmul avoided).
    xc_b = xc.astype(jnp.bfloat16)
    g = jnp.einsum("bnd,bmd->bnm", xc_b, xc_b,
                   preferred_element_type=jnp.float32)        # (TB, N, N)

    # Fused exp argument: -D/(2h^2+eps) with D = ||xi-xj||^2 / dim folded into
    # a single per-batch scale; clamp at 0 (distances are non-negative, bf16
    # Gram error can make the diagonal slightly positive).
    inv_scale = 1.0 / (float(dim_real) * (2.0 * h * h + eps)) # (TB, 1, 1)
    arg = jnp.minimum(inv_scale * (2.0 * g - sq_row - sq_col), 0.0)
    dens = jnp.sum(jnp.exp(arg), axis=2, keepdims=True)       # (TB, N, 1)

    mean_d = jnp.mean(dens, axis=1, keepdims=True)            # (TB, 1, 1)
    # torch.std default is unbiased (ddof=1); guard n==1 (output is zeros
    # either way since the strict > comparison then selects nothing).
    std_d = jnp.sqrt(jnp.sum((dens - mean_d) ** 2, axis=1, keepdims=True)
                     / float(max(n - 1, 1)))
    thr = mean_d - thresh * std_d

    mask = (dens > thr).astype(jnp.float32)                   # (TB, N, 1)
    count = jnp.sum(mask, axis=1, keepdims=True)              # (TB, 1, 1)
    # Masked mean from centered data: sum(mask*x)/count == sum(mask*xc)/count + mu.
    wsum_c = jnp.sum(mask * xc, axis=1, keepdims=True)        # (TB, 1, Dp)
    out = jnp.where(count > 0.0, wsum_c / jnp.maximum(count, 1.0) + mu, 0.0)
    o_ref[...] = out.astype(o_ref.dtype)


def _vmem_capacity_bytes():
    try:
        return int(pltpu.get_tpu_info().vmem_capacity_bytes)
    except Exception:
        return 64 * 1024 * 1024   # conservative fallback (v7x per-TC VMEM)


def kde_anomaly_detector_mean(x, threshold=2.0):
    """x: (B, N, *spatial) -> (B, *spatial)."""
    assert x.ndim >= 3
    x_shape = x.shape
    B, N = x_shape[0], x_shape[1]
    spatial = x_shape[2:]
    dim = int(math.prod(spatial))

    eps = 1e-6
    h_coef = (4.0 / (dim + 2)) ** (1.0 / (dim + 4)) * float(N) ** (-1.0 / (dim + 4))

    # Keep the native dtype (kernel casts to f32 internally): no extra HBM
    # copy / doubled DMA bytes for bf16 inputs.
    xf = x.reshape(B, N, dim)
    itemsize = jnp.dtype(xf.dtype).itemsize

    # Lane-dense feature axis: pad dim up to a multiple of 128 (zeros).  All
    # normalizations inside the kernel use the real dim, and padded features
    # have zero std / zero contribution to distances and to the output.
    dim_p = max(128, -(-dim // 128) * 128)
    if dim_p != dim:
        xf = jnp.pad(xf, ((0, 0), (0, 0), (0, dim_p - dim)))

    # VMEM plan: budget derived from the chip's capacity (v5e/v6e: 128 MiB,
    # v7x: 64 MiB); working set targets ~60% of capacity, scoped limit ~78%
    # to leave compiler/DMA headroom.
    vmem_cap = _vmem_capacity_bytes()
    budget = int(vmem_cap * 0.60)
    vmem_limit = int(vmem_cap * 0.78)

    # Honest per-batch working-set estimate:
    per_b = (2 * N * dim_p * itemsize     # double-buffered input block
             + 3 * N * dim_p * 4          # f32 xc, xc2 (+ slack for x before it dies)
             + N * dim_p * 2              # bf16 copy of xc feeding the MXU
             + 4 * N * N * 4              # g, exp-arg, exp result (+ slack)
             + 8 * dim_p * 4)             # mu/var/output vectors (double-buffered out)
    tb = max(1, min(B, budget // max(per_b, 1)))
    grid_b = -(-B // tb)                  # cdiv: tb chosen by VMEM budget, not divisibility
    b_pad = grid_b * tb
    if b_pad != B:
        # Tail padding with zeros is safe: an all-zero batch row produces a
        # finite bandwidth, an all-false mask and a zero output (sliced off).
        xf = jnp.pad(xf, ((0, b_pad - B), (0, 0), (0, 0)))
    # TODO(synk): for N*dim tiles that exceed VMEM even at tb=1 (large N on
    # v7x's 64 MiB), add a flash-style column-blocked grid axis over the Gram
    # (accumulate dens across an "arbitrary" m axis) so peak VMEM is
    # O(N*TM + N*dim) instead of O(N^2).

    kernel = functools.partial(
        _kde_kernel, n=N, dim_real=dim, h_coef=h_coef,
        thresh=float(threshold), eps=eps,
    )

    cost = pl.CostEstimate(
        flops=int(2 * b_pad * N * N * dim_p      # Gram (MXU)
                  + 2 * b_pad * N * dim_p        # ones-matvec for sq_col
                  + 8 * b_pad * N * dim_p        # centering / xc2 / masked mean
                  + 6 * b_pad * N * N),          # fused exp-arg elementwise
        transcendentals=int(b_pad * N * N + b_pad * dim_p),
        bytes_accessed=int(b_pad * N * dim_p * itemsize + b_pad * dim_p * itemsize),
    )

    out = pl.pallas_call(
        kernel,
        out_shape=jax.ShapeDtypeStruct((b_pad, 1, dim_p), x.dtype),
        grid=(grid_b,),
        in_specs=[pl.BlockSpec((tb, N, dim_p), lambda b: (b, 0, 0))],
        out_specs=pl.BlockSpec((tb, 1, dim_p), lambda b: (b, 0, 0)),
        compiler_params=pltpu.CompilerParams(
            dimension_semantics=("parallel",),
            vmem_limit_bytes=vmem_limit,
        ),
        cost_estimate=cost,
    )(xf)
    return out[:B, 0, :dim].reshape((B,) + spatial)


def _reference(x, threshold=2.0):
    # Pure-JAX mirror of the PyTorch forward (for sanity checking).
    x_shape = x.shape
    B, N = x_shape[0], x_shape[1]
    xf = x.reshape(B, N, -1).astype(jnp.float32)
    dim = xf.shape[-1]
    eps = 1e-6
    sigma = jnp.std(xf, axis=1).mean(axis=1) + eps
    h = (4.0 / (dim + 2)) ** (1.0 / (dim + 4)) * float(N) ** (-1.0 / (dim + 4)) * sigma + eps
    h = h[:, None, None]
    D = jnp.mean((xf[:, :, None, :] - xf[:, None, :, :]) ** 2, axis=-1)
    dens = jnp.exp(-D / (2.0 * h ** 2 + eps)).sum(axis=2)
    mean = dens.mean(axis=1, keepdims=True)
    std = jnp.std(dens, axis=1, keepdims=True, ddof=1)
    thr = mean - threshold * std
    mask = (dens > thr).astype(jnp.float32)
    cnt = mask.sum(axis=1)
    wsum = jnp.einsum("bn,bnd->bd", mask, xf)
    means = jnp.where(cnt[:, None] > 0, wsum / jnp.maximum(cnt, 1.0)[:, None], 0.0)
    return means.reshape((B,) + x_shape[2:]).astype(x.dtype)


if __name__ == "__main__":
    key = jax.random.PRNGKey(0)
    # module input: (B, N, H, W) = (2, 4, 16, 16) -> output (2, 16, 16)
    x = jax.random.normal(key, (2, 4, 16, 16), dtype=jnp.float32)
    out = jax.block_until_ready(kde_anomaly_detector_mean(x, threshold=2.0))
    ref = jax.block_until_ready(_reference(x, threshold=2.0))
    assert out.shape == (2, 16, 16)
    assert jnp.allclose(out, ref, rtol=1e-4, atol=1e-4)

    # Second shape: feature dim (4*20=80) not a multiple of 128 -> exercises
    # the lane-padding path; odd B exercises cdiv-based tiling.
    x2 = jax.random.normal(jax.random.fold_in(key, 1), (3, 5, 4, 20), dtype=jnp.float32)
    out2 = jax.block_until_ready(kde_anomaly_detector_mean(x2, threshold=2.0))
    ref2 = jax.block_until_ready(_reference(x2, threshold=2.0))
    assert out2.shape == (3, 4, 20)
    assert jnp.allclose(out2, ref2, rtol=1e-4, atol=1e-4)

    print("KERNEL_OK")
</pallas_src>

<mosaic_0001>
module attributes {stable_mosaic.version = 11 : i64} {
  func.func @_kde_kernel(%arg0: i32, %arg1: memref<2x4x256xf32, #tpu.memory_space<vmem>>, %arg2: memref<2x1x256xf32, #tpu.memory_space<vmem>>) attributes {dimension_semantics = [#tpu.dimension_semantics<parallel>], iteration_bounds = array<i64: 1>, scalar_prefetch = 0 : i64, scratch_operands = 0 : i64, tpu.core_type = #tpu.core_type<tc>, window_params = [{transform_indices = @transform_0, window_bounds = array<i64: 2, 4, 256>}, {transform_indices = @transform_1, window_bounds = array<i64: 2, 1, 256>}]} {
    %c0 = arith.constant 0 : index
    %c0_0 = arith.constant 0 : index
    %c0_1 = arith.constant 0 : index
    %0 = vector.load %arg1[%c0, %c0_0, %c0_1] : memref<2x4x256xf32, #tpu.memory_space<vmem>>, vector<2x4x256xf32>
    %cst = arith.constant dense<0.000000e+00> : vector<2x256xf32>
    %1 = vector.multi_reduction <add>, %0, %cst [1] : vector<2x4x256xf32> to vector<2x256xf32>
    %2 = vector.shape_cast %1 : vector<2x256xf32> to vector<2x1x256xf32>
    %cst_2 = arith.constant 4.000000e+00 : f32
    %3 = vector.broadcast %cst_2 : f32 to vector<2x1x256xf32>
    %4 = arith.divf %2, %3 : vector<2x1x256xf32>
    %5 = vector.broadcast %4 : vector<2x1x256xf32> to vector<2x4x256xf32>
    %6 = arith.subf %0, %5 : vector<2x4x256xf32>
    %7 = arith.mulf %6, %6 : vector<2x4x256xf32>
    %cst_3 = arith.constant dense<0.000000e+00> : vector<2x256xf32>
    %8 = vector.multi_reduction <add>, %7, %cst_3 [1] : vector<2x4x256xf32> to vector<2x256xf32>
    %9 = vector.shape_cast %8 : vector<2x256xf32> to vector<2x1x256xf32>
    %cst_4 = arith.constant 4.000000e+00 : f32
    %10 = vector.broadcast %cst_4 : f32 to vector<2x1x256xf32>
    %11 = arith.divf %9, %10 : vector<2x1x256xf32>
    %12 = math.sqrt %11 : vector<2x1x256xf32>
    %cst_5 = arith.constant dense<0.000000e+00> : vector<2x1xf32>
    %13 = vector.multi_reduction <add>, %12, %cst_5 [2] : vector<2x1x256xf32> to vector<2x1xf32>
    %14 = vector.shape_cast %13 : vector<2x1xf32> to vector<2x1x1xf32>
    %cst_6 = arith.constant 2.560000e+02 : f32
    %15 = vector.broadcast %cst_6 : f32 to vector<2x1x1xf32>
    %16 = arith.divf %14, %15 : vector<2x1x1xf32>
    %cst_7 = arith.constant 9.99999997E-7 : f32
    %17 = vector.broadcast %cst_7 : f32 to vector<2x1x1xf32>
    %18 = arith.addf %16, %17 : vector<2x1x1xf32>
    %cst_8 = arith.constant 0.978868901 : f32
    %19 = vector.broadcast %cst_8 : f32 to vector<2x1x1xf32>
    %20 = arith.mulf %19, %18 : vector<2x1x1xf32>
    %cst_9 = arith.constant 9.99999997E-7 : f32
    %21 = vector.broadcast %cst_9 : f32 to vector<2x1x1xf32>
    %22 = arith.addf %20, %21 : vector<2x1x1xf32>
    %cst_10 = arith.constant dense<0.000000e+00> : vector<2x4xf32>
    %23 = vector.multi_reduction <add>, %7, %cst_10 [2] : vector<2x4x256xf32> to vector<2x4xf32>
    %24 = vector.shape_cast %23 : vector<2x4xf32> to vector<2x4x1xf32>
    %cst_11 = arith.constant 1.000000e+00 : f32
    %25 = vector.broadcast %cst_11 : f32 to vector<2x1x256xf32>
    "tpu.trace_start"() <{level = 10 : i32, message = "bud,bnd->bun"}> : () -> ()
    %cst_12 = arith.constant dense<0.000000e+00> : vector<2x1x4xf32>
    %26 = tpu.matmul %25, %7, %cst_12 {dimension_numbers = #tpu.dot_dimension_numbers<[2], [2], [1], [1], [0, 0, 0, 1, 1, 1], [0], [0]>} : vector<2x1x256xf32>, vector<2x4x256xf32>, vector<2x1x4xf32> -> vector<2x1x4xf32>
    "tpu.trace_stop"() : () -> ()
    %27 = arith.truncf %6 : vector<2x4x256xf32> to vector<2x4x256xbf16>
    "tpu.trace_start"() <{level = 10 : i32, message = "bnd,bmd->bnm"}> : () -> ()
    %cst_13 = arith.constant dense<0.000000e+00> : vector<2x4x4xf32>
    %28 = tpu.matmul %27, %27, %cst_13 {dimension_numbers = #tpu.dot_dimension_numbers<[2], [2], [1], [1], [0, 0, 0, 1, 1, 1], [0], [0]>} : vector<2x4x256xbf16>, vector<2x4x256xbf16>, vector<2x4x4xf32> -> vector<2x4x4xf32>
    "tpu.trace_stop"() : () -> ()
    %cst_14 = arith.constant 2.000000e+00 : f32
    %29 = vector.broadcast %cst_14 : f32 to vector<2x1x1xf32>
    %30 = arith.mulf %29, %22 : vector<2x1x1xf32>
    %31 = arith.mulf %30, %22 : vector<2x1x1xf32>
    %cst_15 = arith.constant 9.99999997E-7 : f32
    %32 = vector.broadcast %cst_15 : f32 to vector<2x1x1xf32>
    %33 = arith.addf %31, %32 : vector<2x1x1xf32>
    %cst_16 = arith.constant 2.560000e+02 : f32
    %34 = vector.broadcast %cst_16 : f32 to vector<2x1x1xf32>
    %35 = arith.mulf %34, %33 : vector<2x1x1xf32>
    %cst_17 = arith.constant 1.000000e+00 : f32
    %36 = vector.broadcast %cst_17 : f32 to vector<2x1x1xf32>
    %37 = arith.divf %36, %35 : vector<2x1x1xf32>
    %cst_18 = arith.constant 2.000000e+00 : f32
    %38 = vector.broadcast %cst_18 : f32 to vector<2x4x4xf32>
    %39 = arith.mulf %38, %28 : vector<2x4x4xf32>
    %40 = vector.broadcast %24 : vector<2x4x1xf32> to vector<2x4x4xf32>
    %41 = arith.subf %39, %40 : vector<2x4x4xf32>
    %42 = vector.broadcast %26 : vector<2x1x4xf32> to vector<2x4x4xf32>
    %43 = arith.subf %41, %42 : vector<2x4x4xf32>
    %44 = vector.broadcast %37 : vector<2x1x1xf32> to vector<2x4x4xf32>
    %45 = arith.mulf %44, %43 : vector<2x4x4xf32>
    %cst_19 = arith.constant 0.000000e+00 : f32
    %46 = vector.broadcast %cst_19 : f32 to vector<2x4x4xf32>
    %47 = arith.minimumf %45, %46 : vector<2x4x4xf32>
    %48 = math.exp %47 : vector<2x4x4xf32>
    %cst_20 = arith.constant dense<0.000000e+00> : vector<2x4xf32>
    %49 = vector.multi_reduction <add>, %48, %cst_20 [2] : vector<2x4x4xf32> to vector<2x4xf32>
    %50 = vector.shape_cast %49 : vector<2x4xf32> to vector<2x4x1xf32>
    %cst_21 = arith.constant dense<0.000000e+00> : vector<2x1xf32>
    %51 = vector.multi_reduction <add>, %50, %cst_21 [1] : vector<2x4x1xf32> to vector<2x1xf32>
    %52 = vector.shape_cast %51 : vector<2x1xf32> to vector<2x1x1xf32>
    %cst_22 = arith.constant 4.000000e+00 : f32
    %53 = vector.broadcast %cst_22 : f32 to vector<2x1x1xf32>
    %54 = arith.divf %52, %53 : vector<2x1x1xf32>
    %55 = vector.broadcast %54 : vector<2x1x1xf32> to vector<2x4x1xf32>
    %56 = arith.subf %50, %55 : vector<2x4x1xf32>
    %57 = arith.mulf %56, %56 : vector<2x4x1xf32>
    %cst_23 = arith.constant dense<0.000000e+00> : vector<2x1xf32>
    %58 = vector.multi_reduction <add>, %57, %cst_23 [1] : vector<2x4x1xf32> to vector<2x1xf32>
    %59 = vector.shape_cast %58 : vector<2x1xf32> to vector<2x1x1xf32>
    %cst_24 = arith.constant 3.000000e+00 : f32
    %60 = vector.broadcast %cst_24 : f32 to vector<2x1x1xf32>
    %61 = arith.divf %59, %60 : vector<2x1x1xf32>
    %62 = math.sqrt %61 : vector<2x1x1xf32>
    %cst_25 = arith.constant 2.000000e+00 : f32
    %63 = vector.broadcast %cst_25 : f32 to vector<2x1x1xf32>
    %64 = arith.mulf %63, %62 : vector<2x1x1xf32>
    %65 = arith.subf %54, %64 : vector<2x1x1xf32>
    %66 = vector.broadcast %65 : vector<2x1x1xf32> to vector<2x4x1xf32>
    %67 = arith.cmpf ogt, %50, %66 : vector<2x4x1xf32>
    %68 = arith.extui %67 : vector<2x4x1xi1> to vector<2x4x1xi32>
    %69 = arith.sitofp %68 : vector<2x4x1xi32> to vector<2x4x1xf32>
    %cst_26 = arith.constant dense<0.000000e+00> : vector<2x1xf32>
    %70 = vector.multi_reduction <add>, %69, %cst_26 [1] : vector<2x4x1xf32> to vector<2x1xf32>
    %71 = vector.shape_cast %70 : vector<2x1xf32> to vector<2x1x1xf32>
    %72 = vector.broadcast %69 : vector<2x4x1xf32> to vector<2x4x256xf32>
    %73 = arith.mulf %72, %6 : vector<2x4x256xf32>
    %cst_27 = arith.constant dense<0.000000e+00> : vector<2x256xf32>
    %74 = vector.multi_reduction <add>, %73, %cst_27 [1] : vector<2x4x256xf32> to vector<2x256xf32>
    %75 = vector.shape_cast %74 : vector<2x256xf32> to vector<2x1x256xf32>
    %cst_28 = arith.constant 0.000000e+00 : f32
    %76 = vector.broadcast %cst_28 : f32 to vector<2x1x1xf32>
    %77 = arith.cmpf ogt, %71, %76 : vector<2x1x1xf32>
    %cst_29 = arith.constant 1.000000e+00 : f32
    %78 = vector.broadcast %cst_29 : f32 to vector<2x1x1xf32>
    %79 = arith.maximumf %71, %78 : vector<2x1x1xf32>
    %80 = vector.broadcast %79 : vector<2x1x1xf32> to vector<2x1x256xf32>
    %81 = arith.divf %75, %80 : vector<2x1x256xf32>
    %82 = arith.addf %81, %4 : vector<2x1x256xf32>
    %cst_30 = arith.constant 0.000000e+00 : f32
    %83 = vector.shape_cast %77 : vector<2x1x1xi1> to vector<2x1x1xi1>
    %84 = vector.broadcast %83 : vector<2x1x1xi1> to vector<2x1x256xi1>
    %85 = vector.broadcast %cst_30 : f32 to vector<2x1x256xf32>
    %86 = arith.select %84, %82, %85 : vector<2x1x256xi1>, vector<2x1x256xf32>
    %c0_31 = arith.constant 0 : index
    %c0_32 = arith.constant 0 : index
    %c0_33 = arith.constant 0 : index
    %87 = vector.load %arg2[%c0_31, %c0_32, %c0_33] : memref<2x1x256xf32, #tpu.memory_space<vmem>>, vector<2x1x256xf32>
    tpu.vector_store %arg2[%c0_31, %c0_32, %c0_33], %86 {strides = array<i32>} : memref<2x1x256xf32, #tpu.memory_space<vmem>>, vector<2x1x256xf32>,
    return
  }
  func.func @transform_0(%arg0: i32) -> (i32, i32, i32) {
    %c0_i32 = arith.constant 0 : i32
    %c0_i32_0 = arith.constant 0 : i32
    %c0_i32_1 = arith.constant 0 : i32
    return %arg0, %c0_i32, %c0_i32_0 : i32, i32, i32
  }
  func.func @transform_1(%arg0: i32) -> (i32, i32, i32) {
    %c0_i32 = arith.constant 0 : i32
    %c0_i32_0 = arith.constant 0 : i32
    %c0_i32_1 = arith.constant 0 : i32
    return %arg0, %c0_i32, %c0_i32_0 : i32, i32, i32
  }
}

</mosaic_0001>

<bundles_post_ra>
// kernel: tpu_custom_call.1
= control target key start
LH: loop header
LB: loop body
LE: loop exit
PB: predicated region body
PF: predicated region fallthrough
CT: control target
= control target key end

     0   :  { %6 = vsyncpa [#allocation3], 0  ;;  %s938_s0 = inlined_call_operand.hbm [shape: f32[2,4,256], index: 0, kind: input, shape index: {}]   ;;  %s939_s1 = inlined_call_operand.hbm [shape: f32[2,1,256], index: 1, kind: output, shape index: {}]  }
   0x1   :  { %7 = vsyncpa [#allocation4], 0  ;;  %s12_s8 = sshll.u32 %s938_s0, 4  ;;  %s775_s9 = smov [#allocation2]   ;;  %s13_s8 = int_to_ptr.hbm [resolvable:$true] %s12_s8 }
   0x2   :  { %s14_s10 = sshll.u32 %s775_s9, 4  ;;  %s776_s11 = smov 128   ;;  %s15_s10 = int_to_ptr.vmem [resolvable:$true] %s14_s10 }
   0x3   :  { %s777_s12 = smov 8  }
   0x4   :  { %20 = dma.hbm_to_vmem [thread:$0]  %s13_s8, 256, %s15_s10, [#allocation3], %s776_s11, %s776_s11, %s777_s12  }
   0x5   :  { %771 = dma.done.wait [#allocation3], 256  }
   0x6   :  { %772 = vsyncadd [#allocation3], 4294967040  ;;  %v778_v0 = vmov 4.0   ;;  %v26_v2 = vld [vmem:[#allocation2] sm:$0xff]  ;;  %v27_v3 = vld [vmem:[#allocation2 + $0x8] sm:$0xff]  ;;  %vm41_vm0 = vcmask 1043456  }
   0x7   :  { %693 = vrcp.f32 %v778_v0  ;;  %30 = vst [vmem:[#allocation1] ss:$2 sm:$0xff] %v26_v2  ;;  %s783_s0 = smov [#allocation5]   ;;  %s667_s16 = sshll.u32 %s939_s1, 4  ;;  %s668_s16 = int_to_ptr.hbm [resolvable:$true] %s667_s16 }
   0x8   :  { %34 = vst [vmem:[#allocation1 + $0x10] ss:$2 sm:$0xff] %v27_v3  ;;  %s665_s13 = sshll.u32 %s783_s0, 4  ;;  %s784_s17 = smov 32   ;;  %s666_s13 = int_to_ptr.vmem [resolvable:$true] %s665_s13 }
   0x9   :  { %s785_s18 = smov 2  }
   0xd   :  { %v694_v1 = vpop.eup %693 }
   0xe   :  { %v71_v4 = vmul.f32 4.0, %v694_v1  ;;  %v31_v6 = vld.sshfl [vmem:[#allocation1] sm:$0xff pattern:$0x75316420]  ;;  %vm75_vm1 = vweird.f32 %v694_v1 }
   0xf   :  { %v32_v7 = vld.sshfl [vmem:[#allocation1 + $0x8] sm:$0xff pattern:$0x75316420]  ;;  %v42_v8 = vsel %vm41_vm0, %v31_v6, 0.0 }
  0x10   :  { %v72_v5 = vsub.f32 1.0, %v71_v4  ;;  %v49_v9 = vsel %vm41_vm0, %v32_v7, 0.0  ;;  %v35_v10 = vld.sshfl [vmem:[#allocation1 + $0x10] sm:$0xff pattern:$0x75316420]  ;;  %v43_v11 = vrot.slane %v42_v8, 4 }
  0x11   :  { %v50_v12 = vrot.slane %v49_v9, 4  ;;  %v36_v13 = vld.sshfl [vmem:[#allocation1 + $0x18] sm:$0xff pattern:$0x75316420]  ;;  %v56_v14 = vsel %vm41_vm0, %v35_v10, 0.0 }
  0x12   :  { %v73_v15 = vmul.f32 %v694_v1, %v72_v5  ;;  %v57_v16 = vrot.slane %v56_v14, 4  ;;  %v63_v17 = vsel %vm41_vm0, %v36_v13, 0.0  ;;  %v44_v18 = vadd.f32 %v43_v11, %v42_v8 }
  0x13   :  { %v51_v19 = vadd.f32 %v50_v12, %v49_v9  ;;  %v64_v20 = vrot.slane %v63_v17, 4 }
  0x14   :  { %v58_v21 = vadd.f32 %v57_v16, %v56_v14  ;;  %v45_v22 = vrot.slane %v44_v18, 2  ;;  %v74_v25 = vadd.f32 %v694_v1, %v73_v15 }
  0x15   :  { %v52_v23 = vrot.slane %v51_v19, 2  ;;  %v65_v24 = vadd.f32 %v64_v20, %v63_v17 }
  0x16   :  { %v59_v26 = vrot.slane %v58_v21, 2  ;;  %v46_v27 = vadd.f32 %v45_v22, %v44_v18  ;;  %v803_v34 = vsel %vm75_vm1, %v694_v1, %v74_v25 }
  0x17   :  { %v53_v28 = vadd.f32 %v52_v23, %v51_v19  ;;  %v66_v29 = vrot.slane %v65_v24, 2 }
  0x18   :  { %v60_v30 = vadd.f32 %v59_v26, %v58_v21  ;;  %v47_v31 = vrot.slane %v46_v27, 1 }
  0x19   :  { %v54_v32 = vrot.slane %v53_v28, 1  ;;  %v67_v33 = vadd.f32 %v66_v29, %v65_v24 }
  0x1a   :  { %v61_v35 = vrot.slane %v60_v30, 1  ;;  %v48_v36 = vadd.f32 %v47_v31, %v46_v27 }
  0x1b   :  { %v55_v37 = vadd.f32 %v54_v32, %v53_v28  ;;  %v68_v38 = vrot.slane %v67_v33, 1 }
  0x1c   :  { %v62_v39 = vadd.f32 %v61_v35, %v60_v30  ;;  %v806_v40 = vmul.f32 %v803_v34, %v48_v36  ;;  %v779_v35 = vmov 1.0  }
  0x1d   :  { %v809_v41 = vmul.f32 %v803_v34, %v55_v37  ;;  %v69_v42 = vadd.f32 %v68_v38, %v67_v33 }
  0x1e   :  { %v813_v44 = vmul.f32 %v803_v34, %v62_v39 }
  0x1f   :  { %v85_v43 = vrot.slane %v809_v41, 4  ;;  %v816_v45 = vmul.f32 %v803_v34, %v69_v42 }
  0x21   :  { %v87_v46 = vsel %vm41_vm0, %v806_v40, %v85_v43  ;;  %v86_v47 = vrot.slane %v816_v45, 4 }
  0x22   :  { %v821_v48 = vsub.f32 %v26_v2, %v87_v46 }
  0x23   :  { %v88_v49 = vsel %vm41_vm0, %v813_v44, %v86_v47 }
  0x24   :  { %v93_v50 = vmul.f32 %v821_v48, %v821_v48  ;;  %v92_v51 = vsub.f32 %v27_v3, %v88_v49 }
  0x26   :  { %97 = vst [vmem:[#allocation1] ss:$2 sm:$0xff] %v93_v50  ;;  %v94_v52 = vmul.f32 %v92_v51, %v92_v51 }
  0x28   :  { %101 = vst [vmem:[#allocation1 + $0x10] ss:$2 sm:$0xff] %v94_v52 }
  0x2d   :  { %v98_v53 = vld.sshfl [vmem:[#allocation1] sm:$0xff pattern:$0x75316420]  ;;  %v99_v54 = vld.sshfl [vmem:[#allocation1 + $0x8] sm:$0xff pattern:$0x75316420] }
  0x2e   :  { %209 = vst [vmem:[#allocation1] ss:$2 sm:$0xff] %v93_v50  ;;  %v108_v55 = vsel %vm41_vm0, %v98_v53, 0.0  ;;  %v115_v56 = vsel %vm41_vm0, %v99_v54, 0.0 }
  0x2f   :  { %v102_v57 = vld.sshfl [vmem:[#allocation1 + $0x10] sm:$0xff pattern:$0x75316420]  ;;  %v103_v58 = vld.sshfl [vmem:[#allocation1 + $0x18] sm:$0xff pattern:$0x75316420] }
  0x30   :  { %213 = vst [vmem:[#allocation1 + $0x10] ss:$2 sm:$0xff] %v94_v52  ;;  %v109_v59 = vrot.slane %v108_v55, 4  ;;  %v116_v60 = vrot.slane %v115_v56, 4  ;;  %v122_v61 = vsel %vm41_vm0, %v102_v57, 0.0  ;;  %v129_v62 = vsel %vm41_vm0, %v103_v58, 0.0 }
  0x31   :  { %v123_v63 = vrot.slane %v122_v61, 4  ;;  %v130_v0 = vrot.slane %v129_v62, 4 }
  0x32   :  { %v110_v1 = vadd.f32 %v109_v59, %v108_v55  ;;  %v117_v2 = vadd.f32 %v116_v60, %v115_v56 }
  0x33   :  { %v124_v3 = vadd.f32 %v123_v63, %v122_v61  ;;  %v131_v4 = vadd.f32 %v130_v0, %v129_v62 }
  0x34   :  { %v111_v5 = vrot.slane %v110_v1, 2  ;;  %v118_v6 = vrot.slane %v117_v2, 2 }
  0x35   :  { %v210_v7 = vld.sshfl [vmem:[#allocation1] sm:$0xff pattern:$0x75316420]  ;;  %v211_v8 = vld.sshfl [vmem:[#allocation1 + $0x8] sm:$0xff pattern:$0x75316420] }
  0x36   :  { %230 = vst [vmem:[#allocation1] ss:$2 sm:$0xff] %v93_v50  ;;  %v112_v9 = vadd.f32 %v111_v5, %v110_v1  ;;  %v119_v10 = vadd.f32 %v118_v6, %v117_v2  ;;  %v125_v11 = vrot.slane %v124_v3, 2  ;;  %v132_v12 = vrot.slane %v131_v4, 2 }
  0x37   :  { %v214_v13 = vld.sshfl [vmem:[#allocation1 + $0x10] sm:$0xff pattern:$0x75316420]  ;;  %v215_v14 = vld.sshfl [vmem:[#allocation1 + $0x18] sm:$0xff pattern:$0x75316420] }
  0x38   :  { %326 = vst [vmem:[#allocation1 + $0x10] ss:$2 sm:$0xff] %v92_v51  ;;  %v113_v15 = vrot.slane %v112_v9, 1  ;;  %v120_v16 = vrot.slane %v119_v10, 1  ;;  %v126_v17 = vadd.f32 %v125_v11, %v124_v3  ;;  %v133_v18 = vadd.f32 %v132_v12, %v131_v4 }
  0x39   :  { %v220_v38 = vsel %vm41_vm0, %v210_v7, 0.0  ;;  %v221_v39 = vsel %vm41_vm0, %v211_v8, 0.0  ;;  %v225_v61 = vsel %vm41_vm0, %v214_v13, 0.0  ;;  %v226_v62 = vsel %vm41_vm0, %v215_v14, 0.0 }
  0x3a   :  { %v114_v19 = vadd.f32 %v113_v15, %v112_v9  ;;  %v121_v20 = vadd.f32 %v120_v16, %v119_v10  ;;  %v127_v21 = vrot.slane %v126_v17, 1  ;;  %v134_v22 = vrot.slane %v133_v18, 1 }
  0x3b   :  { %v222_v47 = vadd.f32 %v221_v39, %v220_v38  ;;  %v227_v6 = vadd.f32 %v226_v62, %v225_v61 }
  0x3c   :  { %v832_v23 = vmul.f32 %v114_v19, %v803_v34  ;;  %v835_v24 = vmul.f32 %v121_v20, %v803_v34  ;;  %v128_v25 = vadd.f32 %v127_v21, %v126_v17  ;;  %v135_v26 = vadd.f32 %v134_v22, %v133_v18 }
  0x3d   :  { %v231_v27 = vld.sshfl [vmem:[#allocation1] sm:$0xff pattern:$0x75316420]  ;;  %v232_v28 = vld.sshfl [vmem:[#allocation1 + $0x8] sm:$0xff pattern:$0x75316420]  ;;  %223 = vadd.xlane.f32.xlu1 %v222_v47 }
  0x3e   :  { %250 = vmatpush.xpose.msra.mxu0 %v231_v27  ;;  %270 = vmatpush.xpose.msra.mxu1 %v232_v28  ;;  %275 = vst [vmem:[#allocation1] ss:$2 sm:$0xff] %v94_v52  ;;  %695 = vrsqrt.f32 %v832_v23  ;;  %v840_v31 = vmul.f32 %v128_v25, %v803_v34  ;;  %v843_v32 = vmul.f32 %v135_v26, %v803_v34  ;;  %vm147_vm2 = vcmp.eq.f32.partialorder %v832_v23, inf }
  0x3f   :  { %v327_v29 = vld.sshfl [vmem:[#allocation1 + $0x10] sm:$0xff pattern:$0x75316420]  ;;  %v328_v30 = vld.sshfl [vmem:[#allocation1 + $0x18] sm:$0xff pattern:$0x75316420]  ;;  %697 = vrsqrt.f32 %v835_v24 }
  0x40   :  { %v334_v33 = vpack.c.bf16 %v328_v30, %v327_v29  ;;  %557 = vst [vmem:[#allocation1 + $0x10] ss:$2 sm:$0xff] %v92_v51  ;;  %699 = vrsqrt.f32 %v840_v31  ;;  %vm149_vm3 = vcmp.eq.f32.partialorder %v832_v23, 0.0  ;;  %v150_v3 = vand.u32 2147483648, %v832_v23 }
  0x41   :  { %251 = vmatmul.f32.vlgmr.msra.gmra.mxu0 %v779_v35  ;;  %271 = vmatmul.f32.vlgmr.msra.gmra.mxu1 %v779_v35  ;;  %701 = vrsqrt.f32 %v843_v32  ;;  %vm159_vm4 = vcmp.eq.f32.partialorder %v835_v24, inf  ;;  %vm161_vm5 = vcmp.eq.f32.partialorder %v835_v24, 0.0  ;;  %v162_v15 = vand.u32 2147483648, %v835_v24 }
  0x42   :  { %v369_v36 = vunpack.c.l.b16 %v334_v33  ;;  %v370_v37 = vunpack.c.h.b16 %v334_v33  ;;  %vm171_vm6 = vcmp.eq.f32.partialorder %v840_v31, inf  ;;  %v174_v29 = vand.u32 2147483648, %v840_v31 }
  0x43   :  { %vm173_vm7 = vcmp.eq.f32.partialorder %v840_v31, 0.0  ;;  %vm183_vm8 = vcmp.eq.f32.partialorder %v843_v32, inf  ;;  %vm185_vm9 = vcmp.eq.f32.partialorder %v843_v32, 0.0 }
  0x44   :  { %v696_v42 = vpop.eup %695  ;;  %v371_v43 = vpack.c.b16 %v369_v36, %v369_v36  ;;  %v372_v46 = vpack.c.b16 %v370_v37, %v370_v37 }
  0x45   :  { %v698_v49 = vpop.eup %697  ;;  %v276_v50 = vld.sshfl [vmem:[#allocation1] sm:$0xff pattern:$0x75316420]  ;;  %v277_v51 = vld.sshfl [vmem:[#allocation1 + $0x8] sm:$0xff pattern:$0x75316420]  ;;  %v141_v52 = vmul.f32 %v696_v42, %v832_v23  ;;  %228 = vadd.xlane.f32.xlu1 %v227_v6 }
  0x46   :  { %295 = vmatpush.xpose.msra.mxu2 %v276_v50  ;;  %315 = vmatpush.xpose.msra.mxu3 %v277_v51  ;;  %322 = vst [vmem:[#allocation1] ss:$2 sm:$0xff] %v821_v48  ;;  %v153_v53 = vmul.f32 %v698_v49, %v835_v24  ;;  %v700_v54 = vpop.eup %699 }
  0x47   :  { %v142_v55 = vmul.f32 %v696_v42, %v141_v52  ;;  %v702_v56 = vpop.eup %701  ;;  %v165_v58 = vmul.f32 %v700_v54, %v840_v31 }
  0x48   :  { %v154_v57 = vmul.f32 %v698_v49, %v153_v53  ;;  %v177_v60 = vmul.f32 %v702_v56, %v843_v32 }
  0x49   :  { %296 = vmatmul.f32.vlgmr.msra.gmra.mxu2 %v779_v35  ;;  %316 = vmatmul.f32.vlgmr.msra.gmra.mxu3 %v779_v35  ;;  %v143_v59 = vmul.f32 0.5, %v142_v55  ;;  %v166_v0 = vmul.f32 %v700_v54, %v165_v58 }
  0x4a   :  { %382 = vmatpush.bf16.xpose.msrb.mxu2 %v371_v43  ;;  %395 = vmatpush.bf16.xpose.msrb.mxu3 %v372_v46  ;;  %v155_v63 = vmul.f32 0.5, %v154_v57  ;;  %v178_v2 = vmul.f32 %v702_v56, %v177_v60 }
  0x4b   :  { %v144_v1 = vsub.f32 1.5, %v143_v59  ;;  %v167_v5 = vmul.f32 0.5, %v166_v0 }
  0x4c   :  { %v156_v4 = vsub.f32 1.5, %v155_v63  ;;  %v179_v13 = vmul.f32 0.5, %v178_v2 }
  0x4d   :  { %v323_v7 = vld.sshfl [vmem:[#allocation1] sm:$0xff pattern:$0x75316420]  ;;  %v324_v8 = vld.sshfl [vmem:[#allocation1 + $0x8] sm:$0xff pattern:$0x75316420]  ;;  %v145_v9 = vmul.f32 %v696_v42, %v144_v1 }
  0x4e   :  { %v333_v10 = vpack.c.bf16 %v324_v8, %v323_v7  ;;  %553 = vst [vmem:[#allocation1] ss:$2 sm:$0xff] %v821_v48  ;;  %v157_v11 = vmul.f32 %v698_v49, %v156_v4  ;;  %v168_v12 = vsub.f32 1.5, %v167_v5  ;;  %v180_v20 = vsub.f32 1.5, %v179_v13 }
  0x4f   :  { %v146_v14 = vmul.f32 %v145_v9, %v832_v23  ;;  %v780_v42 = vmov 256.0  }
  0x50   :  { %v336_v16 = vunpack.c.l.b16 %v333_v10  ;;  %v337_v17 = vunpack.c.h.b16 %v333_v10  ;;  %v158_v18 = vmul.f32 %v157_v11, %v835_v24  ;;  %v169_v19 = vmul.f32 %v700_v54, %v168_v12 }
  0x51   :  { %v148_v48 = vsel %vm147_vm2, %v832_v23, %v146_v14  ;;  %383 = vmatmul.bf16.vlgmr.msrb.gmra.mxu2 %v371_v43  ;;  %396 = vmatmul.bf16.vlgmr.msrb.gmra.mxu3 %v372_v46  ;;  %v181_v30 = vmul.f32 %v702_v56, %v180_v20  ;;  %v186_v23 = vand.u32 2147483648, %v843_v32  ;;  %703 = vrcp.f32 %v780_v42 }
  0x52   :  { %v338_v21 = vpack.c.b16 %v336_v16, %v336_v16  ;;  %v339_v22 = vpack.c.b16 %v337_v17, %v337_v17  ;;  %v151_v25 = vsel %vm149_vm3, %v150_v3, %v148_v48  ;;  %v160_v26 = vsel %vm159_vm4, %v835_v24, %v158_v18 }
  0x53   :  { %v163_v27 = vsel %vm161_vm5, %v162_v15, %v160_v26  ;;  %v170_v28 = vmul.f32 %v169_v19, %v840_v31  ;;  %v182_v24 = vmul.f32 %v181_v30, %v843_v32  ;;  %vm455_vm4 = vcmask 27648  }
  0x54   :  { %349 = vmatpush.bf16.xpose.msrb.mxu0 %v338_v21  ;;  %362 = vmatpush.bf16.xpose.msrb.mxu1 %v339_v22  ;;  %v188_v33 = vadd.f32 %v163_v27, %v151_v25 }
  0x55   :  { %v172_v35 = vsel %vm171_vm6, %v840_v31, %v170_v28  ;;  %v184_v37 = vsel %vm183_vm8, %v843_v32, %v182_v24 }
  0x56   :  { %189 = vadd.xlane.f32.xlu0 %v188_v33  ;;  %v175_v36 = vsel %vm173_vm7, %v174_v29, %v172_v35  ;;  %v187_v38 = vsel %vm185_vm9, %v186_v23, %v184_v37 }
  0x57   :  { %v191_v39 = vadd.f32 %v187_v38, %v175_v36  ;;  %v704_v43 = vpop.eup %703 }
  0x58   :  { %v195_v46 = vmul.f32 256.0, %v704_v43  ;;  %vm199_vm10 = vweird.f32 %v704_v43 }
  0x5a   :  { %v196_v47 = vsub.f32 1.0, %v195_v46 }
  0x5b   :  { %350 = vmatmul.bf16.vlgmr.msrb.gmra.mxu0 %v338_v21  ;;  %363 = vmatmul.bf16.vlgmr.msrb.gmra.mxu1 %v339_v22 }
  0x5c   :  { %v197_v49 = vmul.f32 %v704_v43, %v196_v47 }
  0x5e   :  { %192 = vadd.xlane.f32.xlu0 %v191_v39  ;;  %v198_v31 = vadd.f32 %v704_v43, %v197_v49 }
  0x60   :  { %v200_v50 = vsel %vm199_vm10, %v704_v43, %v198_v31 }
  0xb0   :  { %v224_v14 = vpop.xlane.xlu1 %223 }
  0xb8   :  { %v229_v38 = vpop.xlane.xlu1 %228 }
  0xbe   :  { %v252_v56 = vpop.f32.mrf.mxu0  ;;  %v272_v57 = vpop.f32.mrf.mxu1 }
  0xbf   :  { %v273_v20 = vadd.f32 %v272_v57, %v252_v56 }
  0xc1   :  { %v443_v29 = vperm.slane %v273_v20, 0 }
  0xc9   :  { %v190_v51 = vpop.xlane.xlu0 %189 }
  0xca   :  { %v201_v52 = vmul.f32 %v200_v50, %v190_v51 }
  0xcc   :  { %v203_v53 = vadd.f32 1e-06, %v201_v52  ;;  %v297_v54 = vpop.f32.mrf.mxu2  ;;  %v317_v55 = vpop.f32.mrf.mxu3 }
  0xcd   :  { %v318_v23 = vadd.f32 %v317_v55, %v297_v54 }
  0xce   :  { %v205_v32 = vmul.f32 0.9788689, %v203_v53 }
  0xcf   :  { %v444_v47 = vperm.slane %v318_v23, 0 }
  0xd0   :  { %v207_v58 = vadd.f32 1e-06, %v205_v32 }
  0xd1   :  { %v193_v59 = vpop.xlane.xlu0 %192 }
  0xd2   :  { %v401_v60 = vmul.f32 2.0, %v207_v58  ;;  %v202_v61 = vmul.f32 %v200_v50, %v193_v59 }
  0xd4   :  { %v403_v62 = vmul.f32 %v401_v60, %v207_v58  ;;  %v204_v63 = vadd.f32 1e-06, %v202_v61  ;;  %v384_v0 = vpop.f32.mrf.mxu2  ;;  %v397_v1 = vpop.f32.mrf.mxu3 }
  0xd5   :  { %v398_v25 = vadd.f32 %v397_v1, %v384_v0 }
  0xd6   :  { %v405_v2 = vadd.f32 1e-06, %v403_v62  ;;  %v206_v3 = vmul.f32 0.9788689, %v204_v63 }
  0xd7   :  { %v440_v24 = vmul.f32 2.0, %v398_v25 }
  0xd8   :  { %v407_v4 = vmul.f32 256.0, %v405_v2  ;;  %v208_v5 = vadd.f32 1e-06, %v206_v3  ;;  %v351_v6 = vpop.f32.mrf.mxu0  ;;  %v364_v7 = vpop.f32.mrf.mxu1 }
  0xd9   :  { %v365_v12 = vadd.f32 %v364_v7, %v351_v6  ;;  %v442_v31 = vsub.f32 %v440_v24, %v229_v38 }
  0xda   :  { %705 = vrcp.f32 %v407_v4  ;;  %v402_v8 = vmul.f32 2.0, %v208_v5  ;;  %v420_v22 = vand.u32 2147483648, %v407_v4  ;;  %v418_v27 = vand.u32 2147483647, %v407_v4 }
  0xdb   :  { %v439_v19 = vmul.f32 2.0, %v365_v12  ;;  %vm414_vm12 = vweird.f32 %v407_v4  ;;  %v446_v56 = vsub.f32 %v442_v31, %v444_v47 }
  0xdc   :  { %v404_v9 = vmul.f32 %v402_v8, %v208_v5  ;;  %v386_v10 = vpop.f32.mrf.mxu2  ;;  %v399_v11 = vpop.f32.mrf.mxu3  ;;  %v421_v35 = vor.u32 1.1754944e-38, %v420_v22  ;;  %vm419_vm14 = vcmp.eq.f32.partialorder %v418_v27, 8.507059e+37  ;;  %v781_v5 = vmov 3.0  }
  0xdd   :  { %v441_v28 = vsub.f32 %v439_v19, %v224_v14 }
  0xde   :  { %v406_v13 = vadd.f32 1e-06, %v404_v9 }
  0xdf   :  { %v445_v37 = vsub.f32 %v441_v28, %v443_v29 }
  0xe0   :  { %v706_v15 = vpop.eup %705  ;;  %v408_v16 = vmul.f32 256.0, %v406_v13  ;;  %v353_v17 = vpop.f32.mrf.mxu0 }
  0xe1   :  { %v366_v18 = vpop.f32.mrf.mxu1  ;;  %v410_v48 = vmul.f32 %v706_v15, %v407_v4  ;;  %vm415_vm11 = vweird.f32 %v706_v15 }
  0xe2   :  { %707 = vrcp.f32 %v408_v16  ;;  %vm416_vm13 = vmor %vm414_vm12, %vm415_vm11  ;;  %v435_v49 = vand.u32 2147483648, %v408_v16  ;;  %v433_v52 = vand.u32 2147483647, %v408_v16  ;;  %vm429_vm1 = vweird.f32 %v408_v16 }
  0xe3   :  { %v411_v21 = vsub.f32 1.0, %v410_v48 }
  0xe4   :  { %v436_v55 = vor.u32 1.1754944e-38, %v435_v49  ;;  %vm434_vm3 = vcmp.eq.f32.partialorder %v433_v52, 8.507059e+37 }
  0xe5   :  { %v412_v26 = vmul.f32 %v706_v15, %v411_v21 }
  0xe7   :  { %v413_v30 = vadd.f32 %v706_v15, %v412_v26 }
  0xe8   :  { %v708_v33 = vpop.eup %707 }
  0xe9   :  { %v417_v36 = vsel %vm416_vm13, %v706_v15, %v413_v30  ;;  %v425_v39 = vmul.f32 %v708_v33, %v408_v16  ;;  %vm430_vm15 = vweird.f32 %v708_v33 }
  0xea   :  { %v422_v42 = vsel %vm419_vm14, %v421_v35, %v417_v36  ;;  %vm431_vm2 = vmor %vm429_vm1, %vm430_vm15  ;;  %vm650_vm1 = vcmask 1040384  }
  0xeb   :  { %v447_v43 = vmul.f32 %v445_v37, %v422_v42  ;;  %v426_v46 = vsub.f32 1.0, %v425_v39 }
  0xed   :  { %v449_v50 = vmin.f32 %v447_v43, 0.0  ;;  %v427_v51 = vmul.f32 %v708_v33, %v426_v46 }
  0xef   :  { %v451_v53 = vmul.f32 1.442695, %v449_v50  ;;  %v428_v54 = vadd.f32 %v708_v33, %v427_v51 }
  0xf1   :  { %709 = vpow2.f32 %v451_v53  ;;  %v432_v32 = vsel %vm431_vm2, %v708_v33, %v428_v54 }
  0xf2   :  { %v437_v57 = vsel %vm434_vm3, %v436_v55, %v432_v32 }
  0xf3   :  { %v448_v58 = vmul.f32 %v446_v56, %v437_v57 }
  0xf5   :  { %v450_v59 = vmin.f32 %v448_v58, 0.0 }
  0xf7   :  { %v710_v60 = vpop.eup %709  ;;  %v453_v61 = vmul.f32 1.442695, %v450_v59 }
  0xf8   :  { %v456_v62 = vsel %vm455_vm4, %v710_v60, 0.0 }
  0xf9   :  { %711 = vpow2.f32 %v453_v61  ;;  %457 = vadd.xlane.f32.xlu2 %v456_v62 }
  0xfa   :  { %713 = vrcp.f32 %v781_v5 }
  0xff   :  { %v712_v63 = vpop.eup %711 }
 0x100   :  { %v459_v0 = vsel %vm455_vm4, %v712_v63, 0.0  ;;  %v714_v12 = vpop.eup %713 }
 0x101   :  { %460 = vadd.xlane.f32.xlu2 %v459_v0  ;;  %v497_v15 = vmul.f32 3.0, %v714_v12  ;;  %vm501_vm5 = vweird.f32 %v714_v12 }
 0x103   :  { %v498_v48 = vsub.f32 1.0, %v497_v15 }
 0x105   :  { %v499_v27 = vmul.f32 %v714_v12, %v498_v48 }
 0x107   :  { %v500_v23 = vadd.f32 %v714_v12, %v499_v27  ;;  %v558_v27 = vld.sshfl [vmem:[#allocation1 + $0x10] sm:$0xff pattern:$0x75316420] }
 0x109   :  { %v502_v39 = vsel %vm501_vm5, %v714_v12, %v500_v23 }
 0x16c   :  { %v887_v1 = vpop.xlane.xlu2 %457 }
 0x16d   :  { %v462_v2 = vsel %vm41_vm0, %v887_v1, 0.0 }
 0x16e   :  { %v463_v3 = vrot.slane %v462_v2, 4 }
 0x170   :  { %v464_v4 = vadd.f32 %v463_v3, %v462_v2 }
 0x172   :  { %v465_v6 = vrot.slane %v464_v4, 2 }
 0x174   :  { %v466_v7 = vadd.f32 %v465_v6, %v464_v4  ;;  %v891_v8 = vpop.xlane.xlu2 %460  ;;  %v554_v4 = vld.sshfl [vmem:[#allocation1] sm:$0xff pattern:$0x75316420]  ;;  %v782_v6 = vmov 0.0  }
 0x175   :  { %v469_v9 = vsel %vm41_vm0, %v891_v8, 0.0 }
 0x176   :  { %v467_v10 = vrot.slane %v466_v7, 1  ;;  %v470_v11 = vrot.slane %v469_v9, 4 }
 0x178   :  { %v468_v13 = vadd.f32 %v467_v10, %v466_v7  ;;  %v471_v14 = vadd.f32 %v470_v11, %v469_v9  ;;  %v555_v9 = vld.sshfl [vmem:[#allocation1 + $0x8] sm:$0xff pattern:$0x75316420] }
 0x17a   :  { %v476_v16 = vmul.f32 %v468_v13, %v803_v34  ;;  %v472_v17 = vrot.slane %v471_v14, 2 }
 0x17c   :  { %v478_v18 = vsub.f32 %v887_v1, %v476_v16  ;;  %v473_v19 = vadd.f32 %v472_v17, %v471_v14 }
 0x17e   :  { %v480_v20 = vmul.f32 %v478_v18, %v478_v18  ;;  %v474_v21 = vrot.slane %v473_v19, 1 }
 0x180   :  { %v482_v22 = vsel %vm41_vm0, %v480_v20, 0.0  ;;  %v475_v25 = vadd.f32 %v474_v21, %v473_v19 }
 0x181   :  { %v483_v26 = vrot.slane %v482_v22, 4 }
 0x182   :  { %v899_v28 = vmul.f32 %v475_v25, %v803_v34 }
 0x183   :  { %v484_v29 = vadd.f32 %v483_v26, %v482_v22 }
 0x184   :  { %v479_v30 = vsub.f32 %v891_v8, %v899_v28 }
 0x185   :  { %v485_v33 = vrot.slane %v484_v29, 2 }
 0x186   :  { %v481_v35 = vmul.f32 %v479_v30, %v479_v30 }
 0x187   :  { %v486_v24 = vadd.f32 %v485_v33, %v484_v29  ;;  %v559_v33 = vld.sshfl [vmem:[#allocation1 + $0x18] sm:$0xff pattern:$0x75316420] }
 0x188   :  { %v489_v36 = vsel %vm41_vm0, %v481_v35, 0.0 }
 0x189   :  { %v487_v37 = vrot.slane %v486_v24, 1  ;;  %v490_v38 = vrot.slane %v489_v36, 4 }
 0x18b   :  { %v488_v42 = vadd.f32 %v487_v37, %v486_v24  ;;  %v491_v43 = vadd.f32 %v490_v38, %v489_v36 }
 0x18d   :  { %v503_v46 = vmul.f32 %v502_v39, %v488_v42  ;;  %v492_v47 = vrot.slane %v491_v43, 2 }
 0x18f   :  { %715 = vrsqrt.f32 %v503_v46  ;;  %v493_v34 = vadd.f32 %v492_v47, %v491_v43  ;;  %vm512_vm6 = vcmp.eq.f32.partialorder %v503_v46, inf  ;;  %v515_v59 = vand.u32 2147483648, %v503_v46 }
 0x190   :  { %vm514_vm7 = vcmp.eq.f32.partialorder %v503_v46, 0.0 }
 0x191   :  { %v494_v49 = vrot.slane %v493_v34, 1 }
 0x193   :  { %v495_v50 = vadd.f32 %v494_v49, %v493_v34 }
 0x195   :  { %v716_v31 = vpop.eup %715  ;;  %v504_v52 = vmul.f32 %v502_v39, %v495_v50 }
 0x196   :  { %v506_v51 = vmul.f32 %v716_v31, %v503_v46 }
 0x197   :  { %717 = vrsqrt.f32 %v504_v52  ;;  %vm524_vm9 = vcmp.eq.f32.partialorder %v504_v52, inf  ;;  %v527_v14 = vand.u32 2147483648, %v504_v52  ;;  %vm526_vm10 = vcmp.eq.f32.partialorder %v504_v52, 0.0 }
 0x198   :  { %v507_v53 = vmul.f32 %v716_v31, %v506_v51 }
 0x19a   :  { %v508_v54 = vmul.f32 0.5, %v507_v53 }
 0x19c   :  { %v509_v55 = vsub.f32 1.5, %v508_v54 }
 0x19d   :  { %v718_v56 = vpop.eup %717 }
 0x19e   :  { %v510_v32 = vmul.f32 %v716_v31, %v509_v55  ;;  %v518_v58 = vmul.f32 %v718_v56, %v504_v52 }
 0x1a0   :  { %v511_v57 = vmul.f32 %v510_v32, %v503_v46  ;;  %v519_v61 = vmul.f32 %v718_v56, %v518_v58 }
 0x1a2   :  { %v513_v60 = vsel %vm512_vm6, %v503_v46, %v511_v57  ;;  %v520_v0 = vmul.f32 0.5, %v519_v61 }
 0x1a3   :  { %v516_v62 = vsel %vm514_vm7, %v515_v59, %v513_v60 }
 0x1a4   :  { %v529_v63 = vmul.f32 2.0, %v516_v62  ;;  %v521_v3 = vsub.f32 1.5, %v520_v0 }
 0x1a6   :  { %v531_v2 = vsub.f32 %v476_v16, %v529_v63  ;;  %v522_v5 = vmul.f32 %v718_v56, %v521_v3 }
 0x1a8   :  { %vm533_vm8 = vcmp.gt.f32.partialorder %v887_v1, %v531_v2  ;;  %v523_v11 = vmul.f32 %v522_v5, %v504_v52 }
 0x1a9   :  { %v680_v7 = vsel %vm533_vm8, 1.0, %v782_v6 }
 0x1aa   :  { %v539_v10 = vsel %vm41_vm0, %v680_v7, 0.0  ;;  %v564_v13 = vmul.f32 %v680_v7, %v554_v4  ;;  %v565_v15 = vmul.f32 %v680_v7, %v555_v9  ;;  %v525_v17 = vsel %vm524_vm9, %v504_v52, %v523_v11 }
 0x1ab   :  { %v540_v12 = vrot.slane %v539_v10, 4  ;;  %v528_v16 = vsel %vm526_vm10, %v527_v14, %v525_v17  ;;  %v655_v11 = vlaneseq }
 0x1ac   :  { %v530_v19 = vmul.f32 2.0, %v528_v16  ;;  %v568_v1 = vsel %vm41_vm0, %v564_v13, 0.0  ;;  %v575_v20 = vsel %vm41_vm0, %v565_v15, 0.0 }
 0x1ad   :  { %v541_v18 = vadd.f32 %v540_v12, %v539_v10  ;;  %v569_v25 = vrot.slane %v568_v1, 4  ;;  %v576_v29 = vrot.slane %v575_v20, 4  ;;  %vm922_vm2 = vcmp.lt.s32.totalorder %v655_v11, 256 }
 0x1ae   :  { %v532_v21 = vsub.f32 %v899_v28, %v530_v19 }
 0x1af   :  { %v542_v48 = vrot.slane %v541_v18, 2  ;;  %v570_v36 = vadd.f32 %v569_v25, %v568_v1  ;;  %v577_v37 = vadd.f32 %v576_v29, %v575_v20 }
 0x1b0   :  { %vm534_vm11 = vcmp.gt.f32.partialorder %v891_v8, %v532_v21 }
 0x1b1   :  { %v543_v22 = vadd.f32 %v542_v48, %v541_v18  ;;  %v681_v30 = vsel %vm534_vm11, 1.0, %v782_v6  ;;  %v571_v8 = vrot.slane %v570_v36, 2  ;;  %v578_v46 = vrot.slane %v577_v37, 2 }
 0x1b2   :  { %v546_v23 = vsel %vm41_vm0, %v681_v30, 0.0  ;;  %v566_v39 = vmul.f32 %v681_v30, %v558_v27  ;;  %v567_v28 = vmul.f32 %v681_v30, %v559_v33 }
 0x1b3   :  { %v544_v26 = vrot.slane %v543_v22, 1  ;;  %v547_v24 = vrot.slane %v546_v23, 4  ;;  %v572_v53 = vadd.f32 %v571_v8, %v570_v36  ;;  %v579_v54 = vadd.f32 %v578_v46, %v577_v37 }
 0x1b4   :  { %v582_v47 = vsel %vm41_vm0, %v566_v39, 0.0  ;;  %v589_v34 = vsel %vm41_vm0, %v567_v28, 0.0 }
 0x1b5   :  { %v911_v35 = vadd.f32 %v544_v26, %v543_v22  ;;  %v548_v42 = vadd.f32 %v547_v24, %v546_v23  ;;  %v583_v50 = vrot.slane %v582_v47, 4  ;;  %v590_v51 = vrot.slane %v589_v34, 4 }
 0x1b6   :  { %v573_v60 = vrot.slane %v572_v53, 1  ;;  %v580_v61 = vrot.slane %v579_v54, 1 }
 0x1b7   :  { %v598_v38 = vmax.f32 %v911_v35, 1.0  ;;  %v549_v43 = vrot.slane %v548_v42, 2  ;;  %v584_v57 = vadd.f32 %v583_v50, %v582_v47  ;;  %v591_v58 = vadd.f32 %v590_v51, %v589_v34 }
 0x1b8   :  { %v574_v6 = vadd.f32 %v573_v60, %v572_v53  ;;  %v581_v7 = vadd.f32 %v580_v61, %v579_v54  ;;  %vm596_vm15 = vcmp.gt.f32.partialorder %v911_v35, 0.0 }
 0x1b9   :  { %719 = vrcp.f32 %v598_v38  ;;  %v550_v49 = vadd.f32 %v549_v43, %v548_v42  ;;  %v611_v62 = vand.u32 2147483648, %v598_v38  ;;  %v609_v0 = vand.u32 2147483647, %v598_v38 }
 0x1ba   :  { %vm605_vm12 = vweird.f32 %v598_v38  ;;  %v585_v3 = vrot.slane %v584_v57, 2  ;;  %v592_v4 = vrot.slane %v591_v58, 2 }
 0x1bb   :  { %v551_v31 = vrot.slane %v550_v49, 1  ;;  %v612_v5 = vor.u32 1.1754944e-38, %v611_v62  ;;  %vm610_vm14 = vcmp.eq.f32.partialorder %v609_v0, 8.507059e+37 }
 0x1bc   :  { %v586_v15 = vadd.f32 %v585_v3, %v584_v57  ;;  %v593_v17 = vadd.f32 %v592_v4, %v591_v58 }
 0x1bd   :  { %v916_v32 = vadd.f32 %v551_v31, %v550_v49 }
 0x1be   :  { %v587_v21 = vrot.slane %v586_v15, 1  ;;  %v594_v22 = vrot.slane %v593_v17, 1 }
 0x1bf   :  { %v720_v52 = vpop.eup %719  ;;  %v599_v59 = vmax.f32 %v916_v32, 1.0  ;;  %vm597_vm7 = vcmp.gt.f32.partialorder %v916_v32, 0.0 }
 0x1c0   :  { %v601_v55 = vmul.f32 %v720_v52, %v598_v38  ;;  %vm606_vm0 = vweird.f32 %v720_v52  ;;  %v588_v23 = vadd.f32 %v587_v21, %v586_v15  ;;  %v595_v35 = vadd.f32 %v594_v22, %v593_v17 }
 0x1c1   :  { %721 = vrcp.f32 %v599_v59  ;;  %vm607_vm13 = vmor %vm605_vm12, %vm606_vm0  ;;  %v627_v25 = vand.u32 2147483648, %v599_v59  ;;  %v625_v29 = vand.u32 2147483647, %v599_v59  ;;  %vm621_vm4 = vweird.f32 %v599_v59 }
 0x1c2   :  { %v602_v56 = vsub.f32 1.0, %v601_v55 }
 0x1c3   :  { %v628_v33 = vor.u32 1.1754944e-38, %v627_v25  ;;  %vm626_vm6 = vcmp.eq.f32.partialorder %v625_v29, 8.507059e+37 }
 0x1c4   :  { %v603_v63 = vmul.f32 %v720_v52, %v602_v56 }
 0x1c6   :  { %v604_v2 = vadd.f32 %v720_v52, %v603_v63 }
 0x1c7   :  { %v722_v12 = vpop.eup %721 }
 0x1c8   :  { %v608_v9 = vsel %vm607_vm13, %v720_v52, %v604_v2  ;;  %v617_v18 = vmul.f32 %v722_v12, %v599_v59  ;;  %vm622_vm3 = vweird.f32 %v722_v12 }
 0x1c9   :  { %v613_v10 = vsel %vm610_vm14, %v612_v5, %v608_v9  ;;  %vm623_vm5 = vmor %vm621_vm4, %vm622_vm3 }
 0x1ca   :  { %v614_v13 = vmul.f32 %v613_v10, %v574_v6  ;;  %v615_v14 = vmul.f32 %v613_v10, %v581_v7  ;;  %v618_v48 = vsub.f32 1.0, %v617_v18 }
 0x1cc   :  { %v632_v16 = vadd.f32 %v614_v13, %v806_v40  ;;  %v633_v19 = vadd.f32 %v615_v14, %v809_v41  ;;  %v619_v27 = vmul.f32 %v722_v12, %v618_v48 }
 0x1ce   :  { %v641_v20 = vsel %vm596_vm15, %v633_v19, 0.0  ;;  %v640_v30 = vsel %vm596_vm15, %v632_v16, 0.0  ;;  %v620_v40 = vadd.f32 %v722_v12, %v619_v27 }
 0x1cf   :  { %v648_v26 = vrot.slane %v641_v20, 7 }
 0x1d0   :  { %v624_v24 = vsel %vm623_vm5, %v722_v12, %v620_v40 }
 0x1d1   :  { %v651_v41 = vsel %vm650_vm1, %v640_v30, %v648_v26  ;;  %v629_v36 = vsel %vm626_vm6, %v628_v33, %v624_v24 }
 0x1d2   :  { %659 = vst.msk [vmem:[#allocation5] sm:$0x3] %vm922_vm2, %v651_v41  ;;  %v630_v37 = vmul.f32 %v629_v36, %v588_v23  ;;  %v631_v38 = vmul.f32 %v629_v36, %v595_v35 }
 0x1d4   :  { %v634_v39 = vadd.f32 %v630_v37, %v813_v44  ;;  %v635_v28 = vadd.f32 %v631_v38, %v816_v45 }
 0x1d6   :  { %v643_v42 = vsel %vm597_vm7, %v635_v28, 0.0  ;;  %v642_v8 = vsel %vm597_vm7, %v634_v39, 0.0 }
 0x1d7   :  { %v649_v43 = vrot.slane %v643_v42, 7 }
 0x1d9   :  { %v652_v46 = vsel %vm650_vm1, %v642_v8, %v649_v43 }
 0x1da   :  { %660 = vst.msk [vmem:[#allocation5 + $0x2] sm:$0x3] %vm922_vm2, %v652_v46 }
 0x1db   :  { %673 = dma.vmem_to_hbm [thread:$0]  %s666_s13, 64, %s668_s16, [#allocation4], %s784_s17, %s784_s17, %s785_s18  }
 0x1dc   :  { %773 = dma.done.wait [#allocation4], 64  }
 0x1dd   :  { %774 = vsyncadd [#allocation4], 4294967232 }
 0x1de   :  { %678 = vsyncpa [#allocation3], 1 }
 0x1df   :  { %679 = vsyncpa [#allocation4], 1 }

</bundles_post_ra>
